<compile_context>
chip_gen: v7x
topology: tpu7x:2x2x1
jax: 0.10.0
libtpu: 0.0.40
codegen_flags: <defaults>
</compile_context>

<pallas_src>
import jax
import jax.numpy as jnp
from jax import lax
from jax.experimental import pallas as pl
from jax.experimental.pallas import tpu as pltpu


def _elu_plus_one(x):
    # elu(x) + 1 == x + 1 for x > 0, exp(x) for x <= 0   (alpha = 1)
    return jnp.where(x > 0, x + 1.0, jnp.exp(x))


def linear_attention2_kernel(x_ref, wqkv_ref, wproj_ref, bproj_ref,
                             y_ref, kv_ref):
    """One (batch, head) pair per grid step; y accumulates over heads."""
    h = pl.program_id(1)

    x = x_ref[0]                               # (N, C) bf16
    N, C = x.shape
    D = wproj_ref.shape[0]

    # Per-head qkv projection: (N, C) @ (C, 3D) -> (N, 3D), f32 accumulation.
    qkv = jnp.dot(x, wqkv_ref[0], preferred_element_type=jnp.float32)

    q = _elu_plus_one(qkv[:, :D])              # (N, D) f32
    k = _elu_plus_one(qkv[:, D:2 * D])         # (N, D) f32
    v = qkv[:, 2 * D:]                         # (N, D) f32

    q_bf = q.astype(jnp.bfloat16)
    k_bf = k.astype(jnp.bfloat16)
    v_bf = v.astype(jnp.bfloat16)

    # kv[d, e] = sum_s k[s, d] * v[s, e]  (contract token axis, no transpose).
    kv_h = lax.dot_general(k_bf, v_bf,
                           dimension_numbers=(((0,), (0,)), ((), ())),
                           preferred_element_type=jnp.float32)        # (D, D)
    kv_ref[0, 0] = kv_h

    # z[s] = 1 / (q[s, :] . sum_s k[s, :]) ; denominator strictly positive.
    ksum = jnp.sum(k, axis=0, keepdims=True)                          # (1, D)
    denom = jnp.sum(q * ksum, axis=-1, keepdims=True)                 # (N, 1)
    z = pl.reciprocal(denom, approx=True)                             # (N, 1)

    # out_h[s, e] = (q @ kv)[s, e] * z[s]
    out_h = jnp.dot(q_bf, kv_h.astype(jnp.bfloat16),
                    preferred_element_type=jnp.float32) * z           # (N, D)

    # This head's slice of the output projection, accumulated into y.
    contrib = jnp.dot(out_h.astype(jnp.bfloat16), wproj_ref[...],
                      preferred_element_type=jnp.float32)             # (N, C)

    @pl.when(h == 0)
    def _init():
        y_ref[0] = jnp.broadcast_to(bproj_ref[...], (N, C))

    y_ref[0] = y_ref[0] + contrib


def linear_attention2(x, wqkv_t, wproj_t, bproj, *, num_heads):
    """x: (B, N, C) f32; wqkv_t: (C, 3C); wproj_t: (C, C); bproj: (1, C)."""
    B, N, C = x.shape
    D = C // num_heads

    # Rearrange qkv weight columns from [3, H, D] ordering to per-head slabs
    # (H, C, 3*D) so the head split happens at the BlockSpec / DMA level.
    wqkv_heads = (wqkv_t.reshape(C, 3, num_heads, D)
                  .transpose(2, 0, 1, 3)
                  .reshape(num_heads, C, 3 * D))

    # bf16 MXU operands (also halves x / weight DMA bytes); accumulation is
    # f32 inside the kernel and both outputs stay f32.
    x_bf = x.astype(jnp.bfloat16)
    wqkv_bf = wqkv_heads.astype(jnp.bfloat16)
    wproj_bf = wproj_t.astype(jnp.bfloat16)
    bproj_f32 = bproj.astype(jnp.float32)

    y, kv = pl.pallas_call(
        linear_attention2_kernel,
        out_shape=(
            jax.ShapeDtypeStruct((B, N, C), jnp.float32),
            jax.ShapeDtypeStruct((B, num_heads, D, D), jnp.float32),
        ),
        grid=(B, num_heads),
        in_specs=[
            pl.BlockSpec((1, N, C), lambda b, h: (b, 0, 0)),        # x
            pl.BlockSpec((1, C, 3 * D), lambda b, h: (h, 0, 0)),    # qkv W (per head)
            pl.BlockSpec((D, C), lambda b, h: (h, 0)),              # proj W rows (per head)
            pl.BlockSpec((1, C), lambda b, h: (0, 0)),              # proj bias
        ],
        out_specs=(
            pl.BlockSpec((1, N, C), lambda b, h: (b, 0, 0)),        # y (accumulated over h)
            pl.BlockSpec((1, 1, D, D), lambda b, h: (b, h, 0, 0)),  # kv
        ),
        compiler_params=pltpu.CompilerParams(
            dimension_semantics=("parallel", "arbitrary")),
    )(x_bf, wqkv_bf, wproj_bf, bproj_f32)
    return y, kv


def linear_attention2_ref(x, wqkv_t, wproj_t, bproj, *, num_heads):
    """Pure-JAX (f32) reference mirroring the PyTorch forward."""
    B, N, C = x.shape
    D = C // num_heads
    qkv = (x @ wqkv_t).reshape(B, N, 3, num_heads, D).transpose(2, 0, 3, 1, 4)
    q, k, v = qkv[0], qkv[1], qkv[2]                      # (B, H, N, D)
    q = jax.nn.elu(q) + 1.0
    k = jax.nn.elu(k) + 1.0
    kv = jnp.einsum('bhsd,bhse->bhde', k, v)              # (B, H, D, D)
    z = 1.0 / jnp.einsum('bhsd,bhd->bhs', q, k.sum(axis=-2))
    out = jnp.einsum('bhde,bhsd,bhs->bhse', kv, q, z)     # (B, H, N, D)
    out = out.transpose(0, 2, 1, 3).reshape(B, N, C)
    y = out @ wproj_t + bproj[0]
    return y, kv


if __name__ == "__main__":
    B, N, C = 2, 16, 32
    num_heads = 4   # head_dim = 8

    key = jax.random.PRNGKey(0)
    kx, kqkv, kproj, kbias = jax.random.split(key, 4)

    x = jax.random.normal(kx, (B, N, C), dtype=jnp.float32)
    # nn.Linear(C, 3C, bias=False): weight (3C, C); we pass the transpose.
    wqkv_t = jax.random.normal(kqkv, (C, 3 * C), dtype=jnp.float32) * 0.1
    # nn.Linear(C, C): weight (C, C) + bias (C,); we pass W^T and bias as (1, C).
    wproj_t = jax.random.normal(kproj, (C, C), dtype=jnp.float32) * 0.1
    bproj = jax.random.normal(kbias, (1, C), dtype=jnp.float32) * 0.1

    y, kv = linear_attention2(x, wqkv_t, wproj_t, bproj, num_heads=num_heads)
    jax.block_until_ready((y, kv))

    y_ref, kv_ref = linear_attention2_ref(
        x, wqkv_t, wproj_t, bproj, num_heads=num_heads)

    assert y.shape == (B, N, C)
    assert kv.shape == (B, num_heads, C // num_heads, C // num_heads)
    # bf16 MXU operands -> compare against the f32 reference with a
    # correspondingly looser tolerance.
    assert jnp.allclose(y, y_ref, atol=1e-1, rtol=1e-1), (
        "y max abs diff", float(jnp.max(jnp.abs(y - y_ref))))
    assert jnp.allclose(kv, kv_ref, atol=1e-1, rtol=1e-1), (
        "kv max abs diff", float(jnp.max(jnp.abs(kv - kv_ref))))

    print("KERNEL_OK")
</pallas_src>

<mosaic_0001>
module attributes {stable_mosaic.version = 11 : i64} {
  func.func @linear_attention2_kernel(%arg0: i32, %arg1: i32, %arg2: memref<1x16x32xbf16, #tpu.memory_space<vmem>>, %arg3: memref<1x32x24xbf16, #tpu.memory_space<vmem>>, %arg4: memref<8x32xbf16, #tpu.memory_space<vmem>>, %arg5: memref<1x32xf32, #tpu.memory_space<vmem>>, %arg6: memref<1x16x32xf32, #tpu.memory_space<vmem>>, %arg7: memref<1x1x8x8xf32, #tpu.memory_space<vmem>>) attributes {dimension_semantics = [#tpu.dimension_semantics<parallel>, #tpu.dimension_semantics<arbitrary>], iteration_bounds = array<i64: 2, 4>, scalar_prefetch = 0 : i64, scratch_operands = 0 : i64, tpu.core_type = #tpu.core_type<tc>, window_params = [{transform_indices = @transform_0, window_bounds = array<i64: 1, 16, 32>}, {transform_indices = @transform_1, window_bounds = array<i64: 1, 32, 24>}, {transform_indices = @transform_2, window_bounds = array<i64: 8, 32>}, {pipeline_mode = #tpu.pipeline_mode<synchronous>, transform_indices = @transform_3, window_bounds = array<i64: 1, 32>}, {transform_indices = @transform_4, window_bounds = array<i64: 1, 16, 32>}, {transform_indices = @transform_5, window_bounds = array<i64: 1, 1, 8, 8>}]} {
    %c0 = arith.constant 0 : index
    %c0_0 = arith.constant 0 : index
    %c0_1 = arith.constant 0 : index
    %0 = vector.load %arg2[%c0, %c0_0, %c0_1] : memref<1x16x32xbf16, #tpu.memory_space<vmem>>, vector<1x16x32xbf16>
    %1 = vector.shape_cast %0 : vector<1x16x32xbf16> to vector<16x32xbf16>
    %c0_2 = arith.constant 0 : index
    %c0_3 = arith.constant 0 : index
    %c0_4 = arith.constant 0 : index
    %2 = vector.load %arg3[%c0_2, %c0_3, %c0_4] : memref<1x32x24xbf16, #tpu.memory_space<vmem>>, vector<1x32x24xbf16>
    %3 = vector.shape_cast %2 : vector<1x32x24xbf16> to vector<32x24xbf16>
    %cst = arith.constant dense<0.000000e+00> : vector<16x24xf32>
    %4 = tpu.matmul %1, %3, %cst {dimension_numbers = #tpu.dot_dimension_numbers<[1], [0], [0], [1], [0, 0, 1, 1], [], []>} : vector<16x32xbf16>, vector<32x24xbf16>, vector<16x24xf32> -> vector<16x24xf32>
    %5 = vector.extract_strided_slice %4 {offsets = [0, 0], sizes = [16, 8], strides = [1, 1]} : vector<16x24xf32> to vector<16x8xf32>
    %cst_5 = arith.constant 0.000000e+00 : f32
    %6 = vector.broadcast %cst_5 : f32 to vector<16x8xf32>
    %7 = arith.cmpf ogt, %5, %6 : vector<16x8xf32>
    %cst_6 = arith.constant 1.000000e+00 : f32
    %8 = vector.broadcast %cst_6 : f32 to vector<16x8xf32>
    %9 = arith.addf %5, %8 : vector<16x8xf32>
    %10 = math.exp %5 : vector<16x8xf32>
    %11 = arith.select %7, %9, %10 : vector<16x8xi1>, vector<16x8xf32>
    %12 = vector.extract_strided_slice %4 {offsets = [0, 8], sizes = [16, 8], strides = [1, 1]} : vector<16x24xf32> to vector<16x8xf32>
    %cst_7 = arith.constant 0.000000e+00 : f32
    %13 = vector.broadcast %cst_7 : f32 to vector<16x8xf32>
    %14 = arith.cmpf ogt, %12, %13 : vector<16x8xf32>
    %cst_8 = arith.constant 1.000000e+00 : f32
    %15 = vector.broadcast %cst_8 : f32 to vector<16x8xf32>
    %16 = arith.addf %12, %15 : vector<16x8xf32>
    %17 = math.exp %12 : vector<16x8xf32>
    %18 = arith.select %14, %16, %17 : vector<16x8xi1>, vector<16x8xf32>
    %19 = vector.extract_strided_slice %4 {offsets = [0, 16], sizes = [16, 8], strides = [1, 1]} : vector<16x24xf32> to vector<16x8xf32>
    %20 = arith.truncf %11 : vector<16x8xf32> to vector<16x8xbf16>
    %21 = arith.truncf %18 : vector<16x8xf32> to vector<16x8xbf16>
    %22 = arith.truncf %19 : vector<16x8xf32> to vector<16x8xbf16>
    %cst_9 = arith.constant dense<0.000000e+00> : vector<8x8xf32>
    %23 = tpu.matmul %21, %22, %cst_9 {dimension_numbers = #tpu.dot_dimension_numbers<[0], [0], [1], [1], [0, 1, 1, 1], [], []>} : vector<16x8xbf16>, vector<16x8xbf16>, vector<8x8xf32> -> vector<8x8xf32>
    %c0_10 = arith.constant 0 : index
    %c0_11 = arith.constant 0 : index
    %c0_12 = arith.constant 0 : index
    %c0_13 = arith.constant 0 : index
    %24 = vector.load %arg7[%c0_10, %c0_11, %c0_12, %c0_13] : memref<1x1x8x8xf32, #tpu.memory_space<vmem>>, vector<1x1x8x8xf32>
    %25 = vector.shape_cast %24 : vector<1x1x8x8xf32> to vector<8x8xf32>
    %26 = vector.shape_cast %23 : vector<8x8xf32> to vector<1x1x8x8xf32>
    tpu.vector_store %arg7[%c0_10, %c0_11, %c0_12, %c0_13], %26 {strides = array<i32>} : memref<1x1x8x8xf32, #tpu.memory_space<vmem>>, vector<1x1x8x8xf32>,
    %cst_14 = arith.constant dense<0.000000e+00> : vector<8xf32>
    %27 = vector.multi_reduction <add>, %18, %cst_14 [0] : vector<16x8xf32> to vector<8xf32>
    %28 = vector.shape_cast %27 : vector<8xf32> to vector<1x8xf32>
    %29 = vector.broadcast %28 : vector<1x8xf32> to vector<16x8xf32>
    %30 = arith.mulf %11, %29 : vector<16x8xf32>
    %cst_15 = arith.constant dense<0.000000e+00> : vector<16xf32>
    %31 = vector.multi_reduction <add>, %30, %cst_15 [1] : vector<16x8xf32> to vector<16xf32>
    %32 = vector.shape_cast %31 : vector<16xf32> to vector<16x1xf32>
    %33 = tpu.reciprocal %32 {approx = true} : vector<16x1xf32> -> vector<16x1xf32>
    %34 = arith.truncf %23 : vector<8x8xf32> to vector<8x8xbf16>
    %cst_16 = arith.constant dense<0.000000e+00> : vector<16x8xf32>
    %35 = tpu.matmul %20, %34, %cst_16 {dimension_numbers = #tpu.dot_dimension_numbers<[1], [0], [0], [1], [0, 0, 1, 1], [], []>} : vector<16x8xbf16>, vector<8x8xbf16>, vector<16x8xf32> -> vector<16x8xf32>
    %36 = vector.broadcast %33 : vector<16x1xf32> to vector<16x8xf32>
    %37 = arith.mulf %35, %36 : vector<16x8xf32>
    %38 = arith.truncf %37 : vector<16x8xf32> to vector<16x8xbf16>
    %c0_17 = arith.constant 0 : index
    %c0_18 = arith.constant 0 : index
    %39 = vector.load %arg4[%c0_17, %c0_18] : memref<8x32xbf16, #tpu.memory_space<vmem>>, vector<8x32xbf16>
    %cst_19 = arith.constant dense<0.000000e+00> : vector<16x32xf32>
    %40 = tpu.matmul %38, %39, %cst_19 {dimension_numbers = #tpu.dot_dimension_numbers<[1], [0], [0], [1], [0, 0, 1, 1], [], []>} : vector<16x8xbf16>, vector<8x32xbf16>, vector<16x32xf32> -> vector<16x32xf32>
    %c0_i32 = arith.constant 0 : i32
    %41 = arith.cmpi eq, %arg1, %c0_i32 : i32
    %42 = arith.extui %41 : i1 to i32
    %c0_i32_20 = arith.constant 0 : i32
    %43 = arith.cmpi ne, %42, %c0_i32_20 : i32
    scf.if %43 {
      %c0_27 = arith.constant 0 : index
      %c0_28 = arith.constant 0 : index
      %50 = vector.load %arg5[%c0_27, %c0_28] : memref<1x32xf32, #tpu.memory_space<vmem>>, vector<1x32xf32>
      %51 = vector.shape_cast %50 : vector<1x32xf32> to vector<1x32xf32>
      %52 = vector.broadcast %51 : vector<1x32xf32> to vector<16x32xf32>
      %c0_29 = arith.constant 0 : index
      %c0_30 = arith.constant 0 : index
      %c0_31 = arith.constant 0 : index
      %53 = vector.load %arg6[%c0_29, %c0_30, %c0_31] : memref<1x16x32xf32, #tpu.memory_space<vmem>>, vector<1x16x32xf32>
      %54 = vector.shape_cast %53 : vector<1x16x32xf32> to vector<16x32xf32>
      %55 = vector.shape_cast %52 : vector<16x32xf32> to vector<1x16x32xf32>
      tpu.vector_store %arg6[%c0_29, %c0_30, %c0_31], %55 {strides = array<i32>} : memref<1x16x32xf32, #tpu.memory_space<vmem>>, vector<1x16x32xf32>,
    } else {
    }
    %c0_21 = arith.constant 0 : index
    %c0_22 = arith.constant 0 : index
    %c0_23 = arith.constant 0 : index
    %44 = vector.load %arg6[%c0_21, %c0_22, %c0_23] : memref<1x16x32xf32, #tpu.memory_space<vmem>>, vector<1x16x32xf32>
    %45 = vector.shape_cast %44 : vector<1x16x32xf32> to vector<16x32xf32>
    %46 = arith.addf %45, %40 : vector<16x32xf32>
    %c0_24 = arith.constant 0 : index
    %c0_25 = arith.constant 0 : index
    %c0_26 = arith.constant 0 : index
    %47 = vector.load %arg6[%c0_24, %c0_25, %c0_26] : memref<1x16x32xf32, #tpu.memory_space<vmem>>, vector<1x16x32xf32>
    %48 = vector.shape_cast %47 : vector<1x16x32xf32> to vector<16x32xf32>
    %49 = vector.shape_cast %46 : vector<16x32xf32> to vector<1x16x32xf32>
    tpu.vector_store %arg6[%c0_24, %c0_25, %c0_26], %49 {strides = array<i32>} : memref<1x16x32xf32, #tpu.memory_space<vmem>>, vector<1x16x32xf32>,
    return
  }
  func.func @transform_0(%arg0: i32, %arg1: i32) -> (i32, i32, i32) {
    %c0_i32 = arith.constant 0 : i32
    %c0_i32_0 = arith.constant 0 : i32
    %c0_i32_1 = arith.constant 0 : i32
    return %arg0, %c0_i32, %c0_i32_0 : i32, i32, i32
  }
  func.func @transform_1(%arg0: i32, %arg1: i32) -> (i32, i32, i32) {
    %c0_i32 = arith.constant 0 : i32
    %c0_i32_0 = arith.constant 0 : i32
    %c0_i32_1 = arith.constant 0 : i32
    return %arg1, %c0_i32, %c0_i32_0 : i32, i32, i32
  }
  func.func @transform_2(%arg0: i32, %arg1: i32) -> (i32, i32) {
    %c0_i32 = arith.constant 0 : i32
    %c0_i32_0 = arith.constant 0 : i32
    return %arg1, %c0_i32 : i32, i32
  }
  func.func @transform_3(%arg0: i32, %arg1: i32) -> (i32, i32) {
    %c0_i32 = arith.constant 0 : i32
    %c0_i32_0 = arith.constant 0 : i32
    %c0_i32_1 = arith.constant 0 : i32
    return %c0_i32, %c0_i32_0 : i32, i32
  }
  func.func @transform_4(%arg0: i32, %arg1: i32) -> (i32, i32, i32) {
    %c0_i32 = arith.constant 0 : i32
    %c0_i32_0 = arith.constant 0 : i32
    %c0_i32_1 = arith.constant 0 : i32
    return %arg0, %c0_i32, %c0_i32_0 : i32, i32, i32
  }
  func.func @transform_5(%arg0: i32, %arg1: i32) -> (i32, i32, i32, i32) {
    %c0_i32 = arith.constant 0 : i32
    %c0_i32_0 = arith.constant 0 : i32
    %c0_i32_1 = arith.constant 0 : i32
    return %arg0, %arg1, %c0_i32, %c0_i32_0 : i32, i32, i32, i32
  }
}

</mosaic_0001>

<bundles_post_ra>
// kernel: tpu_custom_call.1
= control target key start
LH: loop header
LB: loop body
LE: loop exit
PB: predicated region body
PF: predicated region fallthrough
CT: control target
= control target key end

     0   :  { %s1396_s0 = inlined_call_operand.vmem [shape: bf16[2,16,32], index: 0, kind: input, shape index: {}]   ;;  %s1397_s1 = inlined_call_operand.vmem [shape: bf16[4,32,24], index: 1, kind: input, shape index: {}]   ;;  %s1398_s2 = inlined_call_operand.vmem [shape: bf16[32,32], index: 2, kind: input, shape index: {}]   ;;  %s1399_s3 = inlined_call_operand.vmem [shape: f32[1,32], index: 3, kind: input, shape index: {}]   ;;  %s1400_s4 = inlined_call_operand.hbm [shape: f32[2,16,32], index: 4, kind: output, shape index: {0}]   ;;  %s1401_s5 = inlined_call_operand.hbm [shape: f32[2,4,8,8], index: 5, kind: output, shape index: {1}]  }
   0x1   :  { %1410 = sst [smem:[#allocation14_spill]] %s1396_s0 }
   0x2   :  { %1411 = sst [smem:[#allocation15_spill]] %s1397_s1 }
   0x3   :  { %1412 = sst [smem:[#allocation16_spill]] %s1398_s2 }
   0x4   :  { %1413 = sst [smem:[#allocation17_spill]] %s1399_s3 }
   0x5   :  { %1414 = sst [smem:[#allocation18_spill]] %s1400_s4 }
   0x6   :  { %11 = vsyncpa [#allocation3], 0 }
   0x7   :  { %13 = vsyncpa [#allocation3 + $0x1], 0 }
   0x8   :  { %14 = vsyncpa [#allocation5], 0 }
   0x9   :  { %16 = vsyncpa [#allocation5 + $0x1], 0  ;;  %s1119_s18 = smov 0   ;;  %s1121_s19 = smov 0  }
   0xa   :  { %s1123_s20 = smov 0   ;;  %s1125_s21 = smov 0  }
   0xb   :  { %s1127_s22 = smov 0   ;;  %s1129_s23 = smov 0  }
   0xc   :  { %s1131_s24 = smov 0   ;;  %s1133_s25 = smov 0  }
   0xd   :  { %s1135_s26 = smov 0   ;;  %s1137_s27 = smov 0  }
   0xe   :  { %s1139_s28 = smov 0  }
   0xf LB: > { %1415 = sst [smem:[#allocation8_spill]] %s1059_s23  ;;  %s744_s29 = sadd.s32 4294967295, %s1079_s28   ;;  %s1079_s28 = sphi %s1139_s28, %s22_s28   ;;  %s1075_s27 = sphi %s1137_s27, %s1441_s27   ;;  %s1071_s26 = sphi %s1135_s26, %s1440_s26   ;;  %s1067_s25 = sphi %s1133_s25, %s1439_s25   ;;  %s1063_s24 = sphi %s1131_s24, %s1438_s24   ;;  %s1059_s23 = sphi %s1129_s23, %s1437_s23   ;;  %s1055_s22 = sphi %s1127_s22, %s1446_s22   ;;  %s1051_s21 = sphi %s1125_s21, %s1445_s21   ;;  %s1047_s20 = sphi %s1123_s20, %s1444_s20   ;;  %s1043_s19 = sphi %s1121_s19, %s1443_s19   ;;  %s1039_s18 = sphi %s1119_s18, %s1442_s18  }
  0x10   : > { %1416 = sst [smem:[#allocation9_spill]] %s1071_s26  ;;  %s745_s30 = sadd.s32 4294967294, %s1079_s28  }
  0x11   : > { %1417 = sst [smem:[#allocation10_spill]] %s1075_s27  ;;  %s31_s6 = sadd.s32 1, %s1071_s26 }
  0x12   : > { %s34_s7 = sadd.s32 1, %s1075_s27  ;;  %p32_p0 = scmp.ge.s32.totalorder %s31_s6, 4 }
  0x13   : > { %s140_s8 = sadd.s32 1, %s1059_s23  ;;  %p150_p1 = scmp.ne.s32.totalorder %s1059_s23, %s1055_s22 }
  0x14   : > { %p1181_p2 = scmp.eq.s32.totalorder %s744_s29, 7  ;;  %s1448_s6 = smov (%p32_p0, %s31_s6), 0 }
  0x15   : > { %1419 = sst [smem:[#allocation11_spill]] %s1448_s6  ;;  %s1450_s7 = smov (!%p32_p0, %s34_s7), %s1075_s27 }
  0x16   : > { %p1190_p3 = por %p1181_p2, %p150_p1  ;;  %p156_p4 = scmp.ne.s32.totalorder %s1055_s22, %s1051_s21 }
  0x17   : > { %p36_p5 = scmp.ge.s32.totalorder %s1450_s7, 2  ;;  %p1196_p6 = scmp.eq.s32.totalorder %s745_s30, 7 }
  0x18   : > { %s164_s12 = ssub.s32 %s1071_s26, %s1448_s6  ;;  %s168_s13 = sadd.s32 1, %s1047_s20 }
  0x19   : > { %s1452_s7 = smov (%p36_p5, %s1450_s7), 0  ;;  %p1207_p7 = por %p1196_p6, %p156_p4 }
  0x1a   : > { %1422 = sst [smem:[#allocation12_spill]] %s1452_s7  ;;  %p178_p8 = scmp.ne.s32.totalorder %s1047_s20, %s1043_s19 }
  0x1b   : > { %s137_s15 = ssub.s32 %s1075_s27, %s1452_s7  ;;  %p184_p9 = scmp.ne.s32.totalorder %s1043_s19, %s1039_s18 }
  0x1c   : > { %p138_p10 = scmp.eq.s32.totalorder %s137_s15, 0  ;;  %s165_s16 = sor.u32 %s164_s12, %s137_s15 }
  0x1d   : > { %p166_p11 = scmp.eq.s32.totalorder %s165_s16, 0  ;;  %p1219_p12 = por %p178_p8, %p1181_p2 }
  0x1e   : > { %s1224_s29 = scalar_select %p138_p10, %s1059_s23, %s140_s8  }
  0x1f   : > { %s1227_s30 = scalar_select %p166_p11, %s1047_s20, %s168_s13  }
  0x20   : > { %1425 = sst [smem:[#allocation13_spill]] %s1224_s29  ;;  %p1231_p13 = por %p184_p9, %p1196_p6 }
  0x21   : > { %p748_p0 = scmp.ge.s32.totalorder %s1079_s28, 1  ;;  %p229_p1 = scmp.lt.s32.totalorder %s1079_s28, 9 }
  0x22   : > { %s1426_s6 = scalar_select %p1231_p13, 1, 0 }
  0x23   : > { %p230_p4 = pnand %p748_p0, %p229_p1 }
  0x24   : > { %s1403_s9 = sand.u32 (!%p230_p4), 1, %s1055_s22   ;;  %p276_p2 = scmp.lt.s32.totalorder (!%p230_p4), %s1063_s24, 3  ;;  %v1081_v0 = vmov (!%p230_p4), 0.0   ;;  %vm1082_vm0 = vmmov (!%p230_p4), 0   ;;  %vm309_vm1 = vcmask (!%p230_p4), 261120   ;;  %vm436_vm4 = vcmask (!%p230_p4), 130112  }
  0x25   : > { %233 = sbr.rel (%p230_p4) target bundleno = 1210 (0x4ba), region = 36  ;;  %s1241_s8 = sshll.u32 (!%p230_p4), %s1403_s9, 4  ;;  %785 = vmatprep.subr.bf16.mxu0 (!%p230_p4), %v1081_v0  ;;  %789 = vmatprep.mubr.msk.bf16.mxu0 (!%p230_p4), %vm1082_vm0, %v1081_v0  ;;  %vm390_vm5 = vcmask (!%p230_p4), 130048   ;;  %vm434_vm6 = vcmask (!%p230_p4), 64512   ;;  %vm464_vm7 = vcmask (!%p230_p4), 1043456  }
  0x26   : > { %p271_p5 = scmp.lt.s32.totalorder (!%p230_p4), %s1067_s25, 1  ;;  %793 = vmatprep.subr.bf16.mxu1 (!%p230_p4), %v1081_v0  ;;  %795 = vmatprep.mubr.msk.bf16.mxu1 (!%p230_p4), %vm1082_vm0, %v1081_v0  ;;  %s1427_s1 = sld [smem:[#allocation15_spill]] (!%p230_p4) }
  0x27   : > { %s1428_s0 = sld [smem:[#allocation14_spill]] (!%p230_p4)  ;;  %s1083_s26 = smov (!%p230_p4), 120  }
  0x28   : > { %s1084_s27 = smov (!%p230_p4), 112   ;;  %s1429_s2 = sld [smem:[#allocation16_spill]] (!%p230_p4) }
  0x29   : > { %p763_p6 = scmp.ne.s32.totalorder (!%p230_p4), %s1063_s24, 0 }
  0x2c   : > { %s1251_s11 = scalar_select %p276_p2, %s1063_s24, 3 }
  0x2d   : > { %s272_s12 = scalar_select %p271_p5, %s1067_s25, 1 }
  0x2e   : > { %s774_s13 = sshll.u32 %s1251_s11, 4  ;;  %s1430_s3 = sld [smem:[#allocation17_spill]] (!%p763_p6) }
  0x2f   : > { %s280_s9 = scalar_lea.vmem %s1427_s1, %s774_s13  ;;  %s773_s7 = sshll.u32 %s272_s12, 3 }
  0x30   : > { %v918_v1 = vld [vmem:[%s280_s9] sm:$0xff]   ;;  %s275_s29 = scalar_lea.vmem %s1428_s0, %s773_s7  ;;  %v919_v2 = vld [vmem:[%s280_s9 + $0x8] sm:$0xff]   ;;  %s1407_s7 = sand.u32 1, %s1043_s19  }
  0x31   : > { %786 = vmatpush3.bf16.msra.mxu0 %v918_v1  ;;  %v920_v3 = vld [vmem:[%s275_s29] sm:$0xff]   ;;  %s1274_s29 = sshll.u32 %s1407_s7, 3  ;;  %s755_s12 = sshll.u32 %s1251_s11, 2 }
  0x32   : > { %787 = vmatprep.subr.bf16.mxu0 %v1081_v0  ;;  %s1408_s9 = scalar_lea.vmem [#allocation4], %s1274_s29  ;;  %s284_s16 = scalar_lea.vmem %s1429_s2, %s755_s12 }
  0x33   : > { %v512_v41 = vld [vmem:[%s284_s16] sm:$0xf]  ;;  %s263_s11 = scalar_lea.vmem [#allocation2], %s1241_s8 }
  0x34   : > { %v517_v42 = vsel %vm464_vm7, %v512_v41, 0  ;;  %v764_v58 = vld [vmem:[%s1430_s3] ss:$0 sm:$0xff] (!%p763_p6) }
  0x35   : > { %788 = vmatpush3.bf16.msra.mxu0 %v919_v2  ;;  %571 = vst.msk [vmem:[%s263_s11] sm:$0xff] (!%p763_p6), %vm309_vm1, %v764_v58  ;;  %572 = vst.msk [vmem:[%s263_s11 + $0x8] sm:$0xff] (!%p763_p6), %vm309_vm1, %v764_v58 }
  0x36   : > { %805 = vmatprep.subr.bf16.mxu0 %v1081_v0 }
  0x38   : > { %790 = vmatmul.mubr.msk.bf16.vlgmr.msra.gmra.mrb[0].mxu0 %vm309_vm1, %v920_v3 }
  0x39   : > { %807 = vmatprep.mubr.msk.bf16.mxu0 %vm1082_vm0, %v1081_v0  ;;  %806 = vmatpush3.bf16.msra.mxu0 %v517_v42 }
 0x10b   : > { %v347_v4 = vpop.f32.mrb[0].mxu0 }
 0x10c   : > { %v358_v5 = vmul.f32 1.442695, %v347_v4  ;;  %v791_v6 = vpop.f32.mrb[1].mxu0  ;;  %v356_v12 = vadd.f32 1.0, %v347_v4  ;;  %vm354_vm2 = vcmp.gt.f32.partialorder %v347_v4, 0.0 }
 0x10d   : > { %v350_v7 = vpop.f32.mrb[2].mxu0 }
 0x10e   : > { %921 = vpow2.f32 %v358_v5  ;;  %v360_v8 = vmul.f32 1.442695, %v350_v7  ;;  %v792_v9 = vpop.f32.mrb[3].mxu0  ;;  %v365_v10 = vpack.c.bf16 %v350_v7, %v347_v4  ;;  %v357_v13 = vadd.f32 1.0, %v350_v7 }
 0x10f   : > { %vm355_vm3 = vcmp.gt.f32.partialorder %v350_v7, 0.0 }
 0x110   : > { %923 = vpow2.f32 %v360_v8 }
 0x118   : > { %v922_v11 = vpop.eup %921 }
 0x119   : > { %v362_v15 = vsel %vm354_vm2, %v356_v12, %v922_v11 }
 0x11a   : > { %v924_v14 = vpop.eup %923  ;;  %v437_v19 = vsel %vm436_vm4, %v362_v15, 0.0 }
 0x11b   : > { %v363_v16 = vsel %vm355_vm3, %v357_v13, %v924_v14 }
 0x11c   : > { %v364_v17 = vpack.c.bf16 %v363_v16, %v362_v15  ;;  %v438_v18 = vsel %vm436_vm4, %v363_v16, 0.0 }
 0x11d   : > { %v439_v20 = vadd.f32 %v438_v18, %v437_v19 }
 0x11e   : > { %367 = vrot.lane.b32.xlu0 %v364_v17, %s1083_s26 }
 0x11f   : > { %v440_v21 = vrot.slane %v439_v20, 4 }
 0x121   : > { %v441_v22 = vadd.f32 %v440_v21, %v439_v20 }
 0x122   : > { %387 = vrot.lane.b32.xlu0 %v365_v10, %s1084_s27 }
 0x123   : > { %v442_v23 = vrot.slane %v441_v22, 2 }
 0x125   : > { %v443_v24 = vadd.f32 %v442_v23, %v441_v22 }
 0x127   : > { %v444_v25 = vrot.slane %v443_v24, 1 }
 0x129   : > { %v445_v27 = vadd.f32 %v444_v25, %v443_v24 }
 0x190   : > { %v368_v26 = vpop.permute.xlu0 %367 }
 0x191   : > { %370 = vxpose.xlu1.c.b16.start.end [1/1] (short) (narrow) %v368_v26, 16 }
 0x194   : > { %v388_v28 = vpop.permute.xlu0 %387 }
 0x195   : > { %447 = vrot.lane.b32.xlu1 %v445_v27, %s1083_s26  ;;  %794 = vmatpush3.bf16.msra.mxu1 %v388_v28 }
 0x196   : > { %799 = vmatprep.subr.bf16.mxu1 %v1081_v0 }
 0x1f7   : > { %v378_v29 = vpop.trf.xlu1 }
 0x1f8   : > { %796 = vmatmul.mubr.msk.bf16.vlgmr.msra.gmra.mrb[0].mxu1 %vm390_vm5, %v378_v29 }
 0x1f9   : > { %801 = vmatprep.mubr.msk.bf16.mxu1 %vm1082_vm0, %v1081_v0 }
 0x207   : > { %v448_v30 = vpop.permute.xlu1 %447 }
 0x208   : > { %v450_v31 = vmul.f32 %v448_v30, %v362_v15  ;;  %v451_v32 = vmul.f32 %v448_v30, %v363_v16 }
 0x20a   : > { %v455_v33 = vsel %vm434_vm6, %v451_v32, 0.0  ;;  %v452_v34 = vsel %vm434_vm6, %v450_v31, 0.0 }
 0x20b   : > { %456 = vadd.xlane.f32.xlu1 %v455_v33  ;;  %453 = vadd.xlane.f32.xlu0 %v452_v34 }
 0x298   : > { %v457_v43 = vpop.xlane.xlu1 %456  ;;  %v454_v44 = vpop.xlane.xlu0 %453 }
 0x299   : > { %925 = vrcp.f32 %v457_v43 }
 0x29a   : > { %927 = vrcp.f32 %v454_v44 }
 0x2a3   : > { %v926_v46 = vpop.eup %925 }
 0x2a4   : > { %v928_v48 = vpop.eup %927 }
 0x2cb   : > { %v428_v35 = vpop.f32.mrb[0].mxu1 }
 0x2cc   : > { %435 = vst.msk [vmem:[%s1408_s9] sm:$0xff] %vm434_vm6, %v428_v35  ;;  %v460_v36 = vpack.c.bf16 %v428_v35, %v428_v35  ;;  %v797_v37 = vpop.f32.mrb[1].mxu1 }
 0x2cd   : > { %v431_v38 = vpop.f32.mrb[2].mxu1 }
 0x2ce   : > { %v798_v39 = vpop.f32.mrb[3].mxu1  ;;  %v466_v40 = vsel %vm464_vm7, %v460_v36, 0 }
 0x2cf   : > { %800 = vmatpush3.bf16.msra.mxu1 %v466_v40 }
 0x2d2   : > { %802 = vmatmul.mubr.msk.bf16.vlgmr.msra.gmra.mrb[4].mxu1 %vm434_vm6, %v364_v17 }
 0x3a5   : > { %v502_v45 = vpop.f32.mrb[4].mxu1 }
 0x3a6   : > { %v803_v47 = vpop.f32.mrb[5].mxu1  ;;  %v509_v50 = vmul.f32 %v928_v48, %v502_v45 }
 0x3a7   : > { %v505_v49 = vpop.f32.mrb[6].mxu1 }
 0x3a8   : > { %v510_v51 = vmul.f32 %v926_v46, %v505_v49  ;;  %v804_v52 = vpop.f32.mrb[7].mxu1 }
 0x3aa   : > { %v511_v53 = vpack.c.bf16 %v510_v51, %v509_v50 }
 0x3ac   : > { %808 = vmatmul.mubr.msk.bf16.vlgmr.msra.gmra.mrb[4].mxu0 %vm434_vm6, %v511_v53 }
 0x47c   : > { %563 = sbr.rel (%p763_p6) target bundleno = 1155 (0x483), region = 40 }
 0x47f   : > { %v553_v54 = vpop.f32.mrb[4].mxu0 }
 0x480   : > { %v809_v55 = vpop.f32.mrb[5].mxu0 }
 0x481   : > { %v556_v56 = vpop.f32.mrb[6].mxu0 }
 0x482   : > { %v810_v57 = vpop.f32.mrb[7].mxu0 }
 0x483 PF: > { %v573_v59 = vld [vmem:[%s263_s11] sm:$0xff]  ;;  %v574_v60 = vld [vmem:[%s263_s11 + $0x8] sm:$0xff]  ;;  %s775_s12 = sshll.u32 %s1067_s25, 8  ;;  %s1431_s4 = sld [smem:[#allocation18_spill]] }
 0x484   : > { %v575_v61 = vadd.f32 %v573_v59, %v553_v54  ;;  %v576_v62 = vadd.f32 %v574_v60, %v556_v56  ;;  %s598_s16 = sshll.u32 %s263_s11, 4  ;;  %s1432_s26 = sand.u32 1, %s1055_s22   ;;  %s1299_s16 = int_to_ptr.vmem [resolvable:$true] %s598_s16 }
 0x485   : > { %s1305_s27 = scalar_lea.sflag [#allocation3], %s1432_s26  ;;  %s929_s7 = scalar_lea.vmem %s1299_s16, 256 }
 0x486   : > { %577 = vst.msk [vmem:[%s263_s11] sm:$0xff] %vm309_vm1, %v575_v61  ;;  %578 = vst.msk [vmem:[%s263_s11 + $0x8] sm:$0xff] %vm309_vm1, %v576_v62  ;;  %p930_p8 = scmp.ne.s32.totalorder %s1299_s16, %s929_s7 }
 0x488   : > { %p931_p9 = pnand %p930_p8, %p1190_p3 }
 0x489   : > { %s1297_s15 = scalar_lea.hbm %s1431_s4, %s775_s12  ;;  %s1085_s12 = smov [#allocation2]  }
 0x48a   : > { %p932_p10 = pneg %p931_p9  ;;  %s933_s8 = sshll.u32 %s1085_s12, 4  ;;  %s934_s8 = int_to_ptr.vmem [resolvable:$false] %s933_s8 }
 0x48b   : > { %s935_s13 = scalar_lea.vmem %s934_s8, 512  ;;  %p936_p11 = scmp.lt.s32.totalorder %s1299_s16, %s934_s8 }
 0x48c   : > { %p937_p0 = scmp.lt.s32.totalorder %s935_s13, %s929_s7 }
 0x48e   : > { %p938_p1 = por %p937_p0, %p936_p11 }
 0x490   : > { %p939_p4 = pnand %p938_p1, %p932_p10 }
 0x492   : > { %942 = shalt.err (!%p939_p4)
}
 0x493   : > { %s943_s11 = scalar_lea.hbm %s1297_s15, 256  ;;  %s947_s12 = scalar_lea.hbm %s1431_s4, 512 }
 0x494   : > { %p944_p2 = scmp.ne.s32.totalorder %s1297_s15, %s943_s11  ;;  %p948_p8 = scmp.lt.u32.totalorder %s1297_s15, %s1431_s4 }
 0x495   : > { %p949_p9 = scmp.lt.u32.totalorder %s947_s12, %s943_s11  ;;  %p951_p11 = scmp.lt.u32.totalorder %s943_s11, %s1297_s15 }
 0x496   : > { %p945_p5 = pnand %p944_p2, %p1190_p3 }
 0x497   : > { %p950_p10 = por %p949_p9, %p948_p8 }
 0x498   : > { %p946_p6 = pneg %p945_p5 }
 0x499   : > { %p952_p0 = por %p951_p11, %p950_p10 }
 0x49b   : > { %p953_p1 = pnand %p952_p0, %p946_p6 }
 0x49d   : > { %956 = shalt.err (!%p953_p1)
}
 0x49e   : > { %s1086_s7 = smov 128   ;;  %s1087_s9 = smov 8  }
 0x49f   : > { %811 = dma.vmem_to_hbm [thread:$0]  (%p1190_p3), %s1299_s16, 256, %s1297_s15, %s1305_s27, %s1086_s7, %s1086_s7, %s1087_s9  }
 0x4a0   : > { %s769_s0 = sshll.u32 %s1067_s25, 2  ;;  %s1433_s13 = scalar_lea.vmem [#allocation4], %s1274_s29 }
 0x4a1   : > { %s616_s26 = sshll.u32 %s1433_s13, 4  ;;  %s612_s11 = sadd.s32 %s1063_s24, %s769_s0  ;;  %s1333_s26 = int_to_ptr.vmem [resolvable:$true] %s616_s26 }
 0x4a2   : > { %s770_s12 = sshll.u32 %s612_s11, 7  ;;  %s1434_s3 = sand.u32 1, %s1043_s19  }
 0x4a3   : > { %s614_s2 = scalar_lea.hbm %s1401_s5, %s770_s12  ;;  %s585_s4 = scalar_lea.sflag [#allocation5], %s1434_s3 }
 0x4a4   : > { %s957_s23 = scalar_lea.vmem %s1333_s26, 128  ;;  %s1088_s25 = smov [#allocation4]  }
 0x4a5   : > { %p958_p4 = scmp.ne.s32.totalorder %s1333_s26, %s957_s23  ;;  %s961_s10 = sshll.u32 %s1088_s25, 4  ;;  %s962_s10 = int_to_ptr.vmem [resolvable:$false] %s961_s10 }
 0x4a6   : > { %s963_s24 = scalar_lea.vmem %s962_s10, 256  ;;  %p964_p5 = scmp.lt.s32.totalorder %s1333_s26, %s962_s10 }
 0x4a7   : > { %p959_p3 = pnand %p958_p4, %p1219_p12  ;;  %p965_p6 = scmp.lt.s32.totalorder %s963_s24, %s957_s23 }
 0x4a9   : > { %p960_p2 = pneg %p959_p3  ;;  %p966_p8 = por %p965_p6, %p964_p5 }
 0x4ab   : > { %p967_p9 = pnand %p966_p8, %p960_p2 }
 0x4ad   : > { %970 = shalt.err (!%p967_p9)
}
 0x4ae   : > { %s971_s29 = scalar_lea.hbm %s614_s2, 128  ;;  %s975_s15 = scalar_lea.hbm %s1401_s5, 1024 }
 0x4af   : > { %p972_p10 = scmp.ne.s32.totalorder %s614_s2, %s971_s29  ;;  %p976_p1 = scmp.lt.u32.totalorder %s614_s2, %s1401_s5 }
 0x4b0   : > { %p977_p4 = scmp.lt.u32.totalorder %s975_s15, %s971_s29  ;;  %p979_p13 = scmp.lt.u32.totalorder %s971_s29, %s614_s2 }
 0x4b1   : > { %p973_p11 = pnand %p972_p10, %p1219_p12 }
 0x4b2   : > { %p978_p3 = por %p977_p4, %p976_p1 }
 0x4b3   : > { %p974_p0 = pneg %p973_p11 }
 0x4b4   : > { %p980_p5 = por %p979_p13, %p978_p3 }
 0x4b6   : > { %p981_p2 = pnand %p980_p5, %p974_p0 }
 0x4b8   : > { %984 = shalt.err (!%p981_p2)
}
 0x4b9   : > { %812 = dma.vmem_to_hbm [thread:$0]  (%p1219_p12), %s1333_s26, 128, %s614_s2, %s585_s4  }
 0x4ba PF: > { %p822_p6 = scmp.ge.s32.totalorder %s1079_s28, 2  ;;  %s628_s23 = sand.u32 1, %s1051_s21  }
 0x4bb   : > { %s629_s7 = scalar_lea.sflag [#allocation3], %s628_s23 }
 0x4bc   : > { %p816_p8 = pnand %p822_p6, %p1207_p7 }
 0x4be   : > { %1030 = dma.done.wait (!%p816_p8), %s629_s7, 256  }
 0x4bf   : > { %1032 = vsyncadd (!%p816_p8), %s629_s7, 4294967040  ;;  %s637_s9 = sand.u32 1, %s1039_s18   ;;  %p1435_p13 = scmp.ne.s32.totalorder %s1426_s6, 0 }
 0x4c0   : > { %s638_s0 = scalar_lea.sflag [#allocation5], %s637_s9 }
 0x4c1   : > { %p819_p9 = pnand %p822_p6, %p1435_p13 }
 0x4c3   : > { %1034 = dma.done.wait (!%p819_p9), %s638_s0, 128  }
 0x4c4   : > { %1036 = vsyncadd (!%p819_p9), %s638_s0, 4294967168  ;;  %s22_s28 = sadd.s32 1, %s1079_s28   ;;  %s1436_s2 = sld [smem:[#allocation8_spill]] }
 0x4c5   : > { %p19_p12 = scmp.ge.s32.totalorder %s22_s28, 10   ;;  %s1437_s23 = sld [smem:[#allocation13_spill]] }
 0x4c6   : > { %s1438_s24 = sld [smem:[#allocation9_spill]]  ;;  %s1439_s25 = sld [smem:[#allocation10_spill]] }
 0x4c7   : > { %s1440_s26 = sld [smem:[#allocation11_spill]]  ;;  %s1441_s27 = sld [smem:[#allocation12_spill]] }
 0x4c8   : > { %s1442_s18 = smov %s1043_s19  ;;  %s1443_s19 = smov %s1047_s20 }
 0x4c9   : > { %s1444_s20 = smov %s1227_s30  ;;  %s1445_s21 = smov %s1055_s22 }
 0x4ca   : > { %s1446_s22 = smov %s1436_s2  ;;  %21 = sbr.rel (!%p19_p12) target bundleno = 15 (0xf), region = 98 }
 0x4d1   :  { %643 = vsyncpa [#allocation3], 1 }
 0x4d2   :  { %645 = vsyncpa [#allocation3 + $0x1], 1 }
 0x4d3   :  { %646 = vsyncpa [#allocation5], 1 }
 0x4d4   :  { %648 = vsyncpa [#allocation5 + $0x1], 1 }

</bundles_post_ra>
